<compile_context>
chip_gen: v7x
topology: tpu7x:2x2x1
jax: 0.10.0
libtpu: 0.0.40
codegen_flags: <defaults>
</compile_context>

<pallas_src>
import math

import jax
import jax.numpy as jnp
from jax.experimental import pallas as pl
from jax.experimental.pallas import tpu as pltpu


def _diag_linear_bias_kernel(x_ref, w_ref, b_ref, o_ref):
    # Pure VPU elementwise; w/b are (1, tile_f) rows broadcast over tile_m sublanes.
    o_ref[...] = x_ref[...] * w_ref[...] + b_ref[...]


def _diag_linear_nobias_kernel(x_ref, w_ref, o_ref):
    o_ref[...] = x_ref[...] * w_ref[...]


def diag_linear(x, weight, bias=None, *, tile_m=None, tile_f=None,
                vmem_budget_bytes=8 * 1024 * 1024):
    """DiagLinear forward.

    x:      (M, F)
    weight: (F,)
    bias:   (F,) or None
    Returns x * weight (+ bias), same shape/dtype as x.
    """
    M, F = x.shape
    itemsize = jnp.dtype(x.dtype).itemsize
    # Minimum sublane tile per dtype (f32 -> 8, bf16 -> 16, int8/fp8 -> 32).
    min_sublane = max(8, 32 // itemsize)

    # ---- F (lane) tile -------------------------------------------------------
    if tile_f is None:
        # Take the full row when modest; otherwise a large lane-dense multiple of
        # 128 so stores stay unmasked vst and wide F cannot blow the VMEM budget.
        tile_f = F if F <= 2048 else 2048
    tile_f = min(tile_f, F)
    if tile_f != F:
        tile_f = max(128, (tile_f // 128) * 128)

    # ---- M (sublane) tile ----------------------------------------------------
    if tile_m is None:
        # x and out tiles are each double-buffered by the pipeline:
        #   live VMEM ~= 4 * tile_m * tile_f * itemsize bytes (+ tiny w/b rows).
        # Default 8 MiB budget stays under v5e's 16 MiB scoped default and well
        # under v7x's 64 MiB physical VMEM, while ~1024-row tiles amortize the
        # ~0.35 us per-grid-step overhead (>= ~1 MiB of HBM traffic per step).
        max_rows = max(min_sublane, vmem_budget_bytes // (4 * tile_f * itemsize))
        tile_m = min(1024, max_rows)
    # Clamp to the (sublane-padded) row count and align to the sublane tile.
    tile_m = min(tile_m, pl.cdiv(M, min_sublane) * min_sublane)
    tile_m = max(min_sublane, (tile_m // min_sublane) * min_sublane)

    grid = (pl.cdiv(M, tile_m), pl.cdiv(F, tile_f))

    x_spec = pl.BlockSpec((tile_m, tile_f), lambda i, j: (i, j))
    wb_spec = pl.BlockSpec((1, tile_f), lambda i, j: (0, j))   # resident across rows
    out_spec = pl.BlockSpec((tile_m, tile_f), lambda i, j: (i, j))

    w2 = weight.reshape(1, F).astype(x.dtype)
    if bias is not None:
        b2 = bias.reshape(1, F).astype(x.dtype)
        kernel = _diag_linear_bias_kernel
        in_specs = [x_spec, wb_spec, wb_spec]
        args = (x, w2, b2)
    else:
        kernel = _diag_linear_nobias_kernel
        in_specs = [x_spec, wb_spec]
        args = (x, w2)

    return pl.pallas_call(
        kernel,
        out_shape=jax.ShapeDtypeStruct((M, F), x.dtype),
        grid_spec=pl.GridSpec(
            grid=grid,
            in_specs=in_specs,
            out_specs=out_spec,
        ),
        compiler_params=pltpu.CompilerParams(
            # Both grid axes are independent; lets Mosaic shard across the two
            # TensorCores on v7x (and pipeline freely elsewhere).
            dimension_semantics=("parallel", "parallel"),
        ),
    )(*args)


if __name__ == "__main__":
    features = 128
    batch = 16

    key = jax.random.PRNGKey(0)
    kx, kw, kb, kx2 = jax.random.split(key, 4)

    # Deterministic parameter init mirroring reset_parameters():
    #   weight ~ U(-1, 1); bias ~ U(-1/sqrt(features), 1/sqrt(features))
    weight = jax.random.uniform(kw, (features,), jnp.float32, -1.0, 1.0)
    bound = 1.0 / math.sqrt(features)
    bias = jax.random.uniform(kb, (features,), jnp.float32, -bound, bound)

    x = jax.random.normal(kx, (batch, features), jnp.float32)

    out = jax.block_until_ready(diag_linear(x, weight, bias))
    ref = x * weight + bias
    assert out.shape == ref.shape and out.dtype == ref.dtype
    assert jnp.allclose(out, ref, atol=1e-6, rtol=1e-6)

    # Ragged batch (exercises the cdiv tail handling) and the bias=None path.
    x2 = jax.random.normal(kx2, (50, features), jnp.float32)
    out2 = jax.block_until_ready(diag_linear(x2, weight, None))
    assert jnp.allclose(out2, x2 * weight, atol=1e-6, rtol=1e-6)

    print("KERNEL_OK")
</pallas_src>

<mosaic_0001>
module attributes {stable_mosaic.version = 11 : i64} {
  func.func @_diag_linear_bias_kernel(%arg0: i32, %arg1: i32, %arg2: memref<16x128xf32, #tpu.memory_space<vmem>>, %arg3: memref<1x128xf32, #tpu.memory_space<vmem>>, %arg4: memref<1x128xf32, #tpu.memory_space<vmem>>, %arg5: memref<16x128xf32, #tpu.memory_space<vmem>>) attributes {dimension_semantics = [#tpu.dimension_semantics<parallel>, #tpu.dimension_semantics<parallel>], iteration_bounds = array<i64: 1, 1>, scalar_prefetch = 0 : i64, scratch_operands = 0 : i64, tpu.core_type = #tpu.core_type<tc>, window_params = [{transform_indices = @transform_0, window_bounds = array<i64: 16, 128>}, {transform_indices = @transform_1, window_bounds = array<i64: 1, 128>}, {transform_indices = @transform_2, window_bounds = array<i64: 1, 128>}, {transform_indices = @transform_3, window_bounds = array<i64: 16, 128>}]} {
    %c0 = arith.constant 0 : index
    %c0_0 = arith.constant 0 : index
    %0 = vector.load %arg2[%c0, %c0_0] : memref<16x128xf32, #tpu.memory_space<vmem>>, vector<16x128xf32>
    %c0_1 = arith.constant 0 : index
    %c0_2 = arith.constant 0 : index
    %1 = vector.load %arg3[%c0_1, %c0_2] : memref<1x128xf32, #tpu.memory_space<vmem>>, vector<1x128xf32>
    %2 = vector.broadcast %1 : vector<1x128xf32> to vector<16x128xf32>
    %3 = arith.mulf %0, %2 : vector<16x128xf32>
    %c0_3 = arith.constant 0 : index
    %c0_4 = arith.constant 0 : index
    %4 = vector.load %arg4[%c0_3, %c0_4] : memref<1x128xf32, #tpu.memory_space<vmem>>, vector<1x128xf32>
    %5 = vector.broadcast %4 : vector<1x128xf32> to vector<16x128xf32>
    %6 = arith.addf %3, %5 : vector<16x128xf32>
    %c0_5 = arith.constant 0 : index
    %c0_6 = arith.constant 0 : index
    %7 = vector.load %arg5[%c0_5, %c0_6] : memref<16x128xf32, #tpu.memory_space<vmem>>, vector<16x128xf32>
    tpu.vector_store %arg5[%c0_5, %c0_6], %6 {strides = array<i32>} : memref<16x128xf32, #tpu.memory_space<vmem>>, vector<16x128xf32>,
    return
  }
  func.func @transform_0(%arg0: i32, %arg1: i32) -> (i32, i32) {
    %c0_i32 = arith.constant 0 : i32
    return %arg0, %arg1 : i32, i32
  }
  func.func @transform_1(%arg0: i32, %arg1: i32) -> (i32, i32) {
    %c0_i32 = arith.constant 0 : i32
    %c0_i32_0 = arith.constant 0 : i32
    return %c0_i32, %arg1 : i32, i32
  }
  func.func @transform_2(%arg0: i32, %arg1: i32) -> (i32, i32) {
    %c0_i32 = arith.constant 0 : i32
    %c0_i32_0 = arith.constant 0 : i32
    return %c0_i32, %arg1 : i32, i32
  }
  func.func @transform_3(%arg0: i32, %arg1: i32) -> (i32, i32) {
    %c0_i32 = arith.constant 0 : i32
    return %arg0, %arg1 : i32, i32
  }
}

</mosaic_0001>

<bundles_post_ra>
// kernel: tpu_custom_call.1
= control target key start
LH: loop header
LB: loop body
LE: loop exit
PB: predicated region body
PF: predicated region fallthrough
CT: control target
= control target key end

     0   :  { %8 = vsyncpa [#allocation3], 0  ;;  %s182_s0 = inlined_call_operand.hbm [shape: f32[16,128], index: 0, kind: input, shape index: {}]   ;;  %s183_s1 = inlined_call_operand.vmem [shape: f32[1,128], index: 1, kind: input, shape index: {}]   ;;  %s184_s2 = inlined_call_operand.vmem [shape: f32[1,128], index: 2, kind: input, shape index: {}]   ;;  %s185_s3 = inlined_call_operand.hbm [shape: f32[16,128], index: 3, kind: output, shape index: {}]  }
   0x1   :  { %9 = vsyncpa [#allocation4], 0  ;;  %s122_s12 = smov [#allocation2]   ;;  %s74_s16 = scalar_lea.hbm %s182_s0, 256 }
   0x2   :  { %s15_s13 = sshll.u32 %s122_s12, 4  ;;  %p75_p0 = scmp.ne.s32.totalorder %s182_s0, %s74_s16  ;;  %s16_s13 = int_to_ptr.vmem [resolvable:$true] %s15_s13 }
   0x3   :  { %p78_p1 = scmp.lt.u32.totalorder %s74_s16, %s182_s0 }
   0x5   :  { %p80_p2 = pnand %p78_p1, %p75_p0 }
   0x7   :  { %83 = shalt.err (!%p80_p2)
}
   0x8   :  { %s84_s21 = scalar_lea.vmem %s16_s13, 256  ;;  %p89_p4 = scmp.lt.s32.totalorder %s16_s13, %s16_s13 }
   0x9   :  { %p85_p3 = scmp.ne.s32.totalorder %s16_s13, %s84_s21  ;;  %p90_p5 = scmp.lt.s32.totalorder %s84_s21, %s84_s21 }
   0xb   :  { %p91_p6 = por %p90_p5, %p89_p4 }
   0xd   :  { %p92_p7 = pnand %p91_p6, %p85_p3 }
   0xf   :  { %95 = shalt.err (!%p92_p7)
}
  0x10   :  { %s123_s22 = smov 128   ;;  %s124_s23 = smov 8  }
  0x11   :  { %21 = dma.hbm_to_vmem [thread:$0]  %s182_s0, 256, %s16_s13, [#allocation3], %s123_s22, %s123_s22, %s124_s23  }
  0x12   :  { %118 = dma.done.wait [#allocation3], 256  }
  0x13   :  { %119 = vsyncadd [#allocation3], 4294967040  ;;  %v29_v0 = vld [vmem:[#allocation2] sm:$0xff]  ;;  %v30_v4 = vld [vmem:[#allocation2 + $0x8] sm:$0xff]  ;;  %s125_s30 = smov [#allocation5]  }
  0x14   :  { %v68_v1 = vld [vmem:[%s183_s1] ss:$0 sm:$0xff]  ;;  %s56_s4 = sshll.u32 %s125_s30, 4  ;;  %s57_s4 = int_to_ptr.vmem [resolvable:$true] %s56_s4 }
  0x15   :  { %v69_v2 = vld [vmem:[%s184_s2] ss:$0 sm:$0xff]  ;;  %v38_v3 = vmul.f32 %v68_v1, %v29_v0  ;;  %v39_v5 = vmul.f32 %v68_v1, %v30_v4  ;;  %s96_s0 = scalar_lea.vmem %s57_s4, 256  ;;  %p101_p9 = scmp.lt.s32.totalorder %s57_s4, %s57_s4 }
  0x16   :  { %p97_p8 = scmp.ne.s32.totalorder %s57_s4, %s96_s0  ;;  %p102_p10 = scmp.lt.s32.totalorder %s96_s0, %s96_s0 }
  0x17   :  { %v47_v6 = vadd.f32 %v69_v2, %v38_v3  ;;  %v48_v7 = vadd.f32 %v69_v2, %v39_v5 }
  0x18   :  { %p103_p11 = por %p102_p10, %p101_p9 }
  0x19   :  { %49 = vst [vmem:[#allocation5] sm:$0xff] %v47_v6  ;;  %50 = vst [vmem:[#allocation5 + $0x8] sm:$0xff] %v48_v7 }
  0x1a   :  { %p104_p12 = pnand %p103_p11, %p97_p8 }
  0x1c   :  { %107 = shalt.err (!%p104_p12)
}
  0x1d   :  { %s108_s2 = scalar_lea.hbm %s185_s3, 256 }
  0x1e   :  { %p109_p13 = scmp.ne.s32.totalorder %s185_s3, %s108_s2  ;;  %p112_p0 = scmp.lt.u32.totalorder %s108_s2, %s185_s3 }
  0x20   :  { %p114_p1 = pnand %p112_p0, %p109_p13 }
  0x22   :  { %117 = shalt.err (!%p114_p1)
}
  0x23   :  { %62 = dma.vmem_to_hbm [thread:$0]  %s57_s4, 256, %s185_s3, [#allocation4], %s123_s22, %s123_s22, %s124_s23  }
  0x24   :  { %120 = dma.done.wait [#allocation4], 256  }
  0x25   :  { %121 = vsyncadd [#allocation4], 4294967040 }
  0x26   :  { %66 = vsyncpa [#allocation3], 1 }
  0x27   :  { %67 = vsyncpa [#allocation4], 1 }

</bundles_post_ra>
